<compile_context>
chip_gen: v7x
topology: tpu7x:2x2x1
jax: 0.10.0
libtpu: 0.0.40
codegen_flags: <defaults>
</compile_context>

<pallas_src>
import numpy as np
import jax
import jax.numpy as jnp
from jax.experimental import pallas as pl
from jax.experimental.pallas import tpu as pltpu

# ---- model hyper-parameters (consistent with the module) ----
IN_NET = 24            # features consumed by the MLP (x[:, :24])
O = 8                  # out_features -> transition matrix is (O, O)
OO = O * O             # 64 flattened logits
WIDTH = 32             # hidden width
DIAG_BIAS = 13.0       # bias added to the diagonal of the logits
B = 16                 # batch (single grid step)
IN_FULL = IN_NET + O   # 32 = full input feature width


def _transition_kernel(x_ref, w_ref, c_ref, b_ref, out_ref):
    """x:(B,32)  w:(32,192)=[W1pad|W2|W3|T]  c:(64,192)=[GS|R]
       b:(8,128): row0=[b1|b2|b3+diag_bias], row1=[eye_flat|0]  out:(B,128)."""
    x = x_ref[...]                                   # (B, 32)

    # ---- MLP: fc_in -> ReLU -> Linear -> ReLU -> fc_out (all lane-dense) ----
    h = jnp.dot(x, w_ref[:, 0:32],
                preferred_element_type=jnp.float32) + b_ref[0:1, 0:32]
    h = jnp.maximum(h, 0.0)
    h = jnp.dot(h, w_ref[:, 32:64],
                preferred_element_type=jnp.float32) + b_ref[0:1, 32:64]
    h = jnp.maximum(h, 0.0)
    # logits stay flat (B, 64); the diagonal bias is pre-folded into packed b3.
    logits = jnp.dot(h, w_ref[:, 64:128],
                     preferred_element_type=jnp.float32) + b_ref[0:1, 64:128]

    # ---- softmax over dim=-2 of the (B, O, O) view ----
    # For flat index k = i*O + j the softmax group is {k' : k' % O == j}.
    # Per-column max via a 3-step circular lane-shift tournament (stays 64-lane dense).
    m = logits
    for s in (8, 16, 32):
        m = jnp.maximum(m, jnp.concatenate([m[:, s:], m[:, :s]], axis=1))
    e = jnp.exp(logits - m)                          # (B, 64)
    # Column-group sums broadcast back to all 64 lanes with one MXU pass:
    # GS[k, k'] = 1 iff k % 8 == k' % 8.
    denom = jnp.dot(e, c_ref[:, 0:64], preferred_element_type=jnp.float32)
    tmat = e / denom                                 # softmax, still (B, 64)

    # subtract the flattened identity
    tmat_nd = tmat - b_ref[1:2, 0:64]

    # deltas[b, i] = sum_j tmat_nd[b, i*8+j] * x[b, 24+j]
    # xt replicated across row-groups via constant T (MXU): (x @ T)[b,i*8+j] = x[b,24+j]
    xt_rep = jnp.dot(x, w_ref[:, 128:192], preferred_element_type=jnp.float32)
    prod = tmat_nd * xt_rep                          # (B, 64)
    # Group-sum to a lane-dense padded output: R[k, k//8] = 1, cols 8:128 zero.
    out_ref[...] = jnp.dot(prod, c_ref[:, 64:192],
                           preferred_element_type=jnp.float32)


def pack_params(w1, b1, w2, b2, w3, b3):
    """Host-side, one-time packing of parameters + constant helper matrices
    into three lane-dense slabs. Weights are the (in, out) = W_torch.T layout."""
    w1 = np.asarray(w1, np.float32); b1 = np.asarray(b1, np.float32)
    w2 = np.asarray(w2, np.float32); b2 = np.asarray(b2, np.float32)
    w3 = np.asarray(w3, np.float32); b3 = np.asarray(b3, np.float32)

    eye_flat = np.eye(O, dtype=np.float32).reshape(-1)            # (64,)

    # weight slab (32, 192): [W1 zero-padded to 32 rows | W2 | W3 | T]
    w_slab = np.zeros((IN_FULL, 192), np.float32)
    w_slab[:IN_NET, 0:32] = w1
    w_slab[:, 32:64] = w2
    w_slab[:, 64:128] = w3
    for i in range(O):            # T[24+j, i*8+j] = 1  (xt replication matrix)
        for j in range(O):
            w_slab[IN_NET + j, 128 + i * O + j] = 1.0

    # constant slab (64, 192): [GS | R]
    c_slab = np.zeros((OO, 192), np.float32)
    k = np.arange(OO)
    c_slab[:, 0:64] = (k[:, None] % O == k[None, :] % O).astype(np.float32)  # GS
    c_slab[k, 64 + k // O] = 1.0                                             # R

    # bias slab (8, 128): row0 = [b1 | b2 | b3 + diag_bias*eye], row1 = [eye_flat | 0]
    b_slab = np.zeros((8, 128), np.float32)
    b_slab[0, 0:32] = b1
    b_slab[0, 32:64] = b2
    b_slab[0, 64:128] = b3 + DIAG_BIAS * eye_flat
    b_slab[1, 0:64] = eye_flat

    return jnp.asarray(w_slab), jnp.asarray(c_slab), jnp.asarray(b_slab)


def transition_forward(x, w_slab, c_slab, b_slab):
    """x: (B, 32) float32.  Returns deltas: (B, O) float32."""
    bsz = x.shape[0]
    x = x.astype(jnp.float32)
    out = pl.pallas_call(
        _transition_kernel,
        out_shape=jax.ShapeDtypeStruct((bsz, 128), jnp.float32),
        grid=(1,),
        in_specs=[
            pl.BlockSpec((bsz, IN_FULL), lambda i: (0, 0)),
            pl.BlockSpec((IN_FULL, 192), lambda i: (0, 0)),
            pl.BlockSpec((OO, 192), lambda i: (0, 0)),
            pl.BlockSpec((8, 128), lambda i: (0, 0)),
        ],
        out_specs=pl.BlockSpec((bsz, 128), lambda i: (0, 0)),
        compiler_params=pltpu.CompilerParams(
            dimension_semantics=("arbitrary",)),
    )(x, w_slab, c_slab, b_slab)
    return out[:, :O]


def _reference(x, w1, b1, w2, b2, w3, b3):
    """Pure-JAX reference mirroring the PyTorch forward (in float32)."""
    x = x.astype(jnp.float32)
    xn, xt = x[:, :IN_NET], x[:, IN_NET:]
    h = jnp.maximum(xn @ w1 + b1, 0.0)
    h = jnp.maximum(h @ w2 + b2, 0.0)
    logits = (h @ w3 + b3).reshape(-1, O, O)
    eye = jnp.eye(O, dtype=jnp.float32)
    logits = logits + DIAG_BIAS * eye[None]
    tmat = jax.nn.softmax(logits, axis=-2)
    tmat_nd = tmat - eye[None]
    return jnp.einsum('bij,bj->bi', tmat_nd, xt)


if __name__ == "__main__":
    key = jax.random.PRNGKey(0)
    kx, k1, k2, k3, kb1, kb2, kb3 = jax.random.split(key, 7)

    # deterministic synthetic parameters (W stored as (in, out) = W_torch.T)
    w1 = jax.random.normal(k1, (IN_NET, WIDTH), jnp.float32) * 0.1
    b1 = jax.random.normal(kb1, (WIDTH,), jnp.float32) * 0.1
    w2 = jax.random.normal(k2, (WIDTH, WIDTH), jnp.float32) * 0.1
    b2 = jax.random.normal(kb2, (WIDTH,), jnp.float32) * 0.1
    w3 = jax.random.normal(k3, (WIDTH, OO), jnp.float32) * 0.1
    b3 = jax.random.normal(kb3, (OO,), jnp.float32) * 0.1

    x = jax.random.normal(kx, (B, IN_FULL), jnp.float32)

    # one-time host-side packing of parameters + constants
    w_slab, c_slab, b_slab = pack_params(w1, b1, w2, b2, w3, b3)

    deltas = transition_forward(x, w_slab, c_slab, b_slab)
    deltas = jax.block_until_ready(deltas)

    ref = _reference(x, w1, b1, w2, b2, w3, b3)
    if not jnp.allclose(deltas, ref, atol=1e-5, rtol=1e-5):
        err = float(jnp.max(jnp.abs(deltas - ref)))
        raise AssertionError(f"Pallas kernel does not match reference (max abs err {err})")

    print("KERNEL_OK")
</pallas_src>

<mosaic_0001>
module attributes {stable_mosaic.version = 11 : i64} {
  func.func @_transition_kernel(%arg0: i32, %arg1: memref<16x32xf32, #tpu.memory_space<vmem>>, %arg2: memref<32x192xf32, #tpu.memory_space<vmem>>, %arg3: memref<64x192xf32, #tpu.memory_space<vmem>>, %arg4: memref<8x128xf32, #tpu.memory_space<vmem>>, %arg5: memref<16x128xf32, #tpu.memory_space<vmem>>) attributes {dimension_semantics = [#tpu.dimension_semantics<arbitrary>], iteration_bounds = array<i64: 1>, scalar_prefetch = 0 : i64, scratch_operands = 0 : i64, tpu.core_type = #tpu.core_type<tc>, window_params = [{pipeline_mode = #tpu.pipeline_mode<synchronous>, transform_indices = @transform_0, window_bounds = array<i64: 16, 32>}, {pipeline_mode = #tpu.pipeline_mode<synchronous>, transform_indices = @transform_1, window_bounds = array<i64: 32, 192>}, {pipeline_mode = #tpu.pipeline_mode<synchronous>, transform_indices = @transform_2, window_bounds = array<i64: 64, 192>}, {pipeline_mode = #tpu.pipeline_mode<synchronous>, transform_indices = @transform_3, window_bounds = array<i64: 8, 128>}, {pipeline_mode = #tpu.pipeline_mode<synchronous>, transform_indices = @transform_4, window_bounds = array<i64: 16, 128>}]} {
    %c0 = arith.constant 0 : index
    %c0_0 = arith.constant 0 : index
    %0 = vector.load %arg1[%c0, %c0_0] : memref<16x32xf32, #tpu.memory_space<vmem>>, vector<16x32xf32>
    %c0_1 = arith.constant 0 : index
    %c0_2 = arith.constant 0 : index
    %1 = vector.load %arg2[%c0_1, %c0_2] : memref<32x192xf32, #tpu.memory_space<vmem>>, vector<32x32xf32>
    %cst = arith.constant dense<0.000000e+00> : vector<16x32xf32>
    %2 = tpu.matmul %0, %1, %cst {dimension_numbers = #tpu.dot_dimension_numbers<[1], [0], [0], [1], [0, 0, 1, 1], [], []>} : vector<16x32xf32>, vector<32x32xf32>, vector<16x32xf32> -> vector<16x32xf32>
    %c0_3 = arith.constant 0 : index
    %c0_4 = arith.constant 0 : index
    %3 = vector.load %arg4[%c0_3, %c0_4] : memref<8x128xf32, #tpu.memory_space<vmem>>, vector<1x32xf32>
    %4 = vector.broadcast %3 : vector<1x32xf32> to vector<16x32xf32>
    %5 = arith.addf %2, %4 : vector<16x32xf32>
    %cst_5 = arith.constant 0.000000e+00 : f32
    %6 = vector.broadcast %cst_5 : f32 to vector<16x32xf32>
    %7 = arith.maximumf %5, %6 : vector<16x32xf32>
    %c0_6 = arith.constant 0 : index
    %c32 = arith.constant 32 : index
    %8 = vector.load %arg2[%c0_6, %c32] : memref<32x192xf32, #tpu.memory_space<vmem>>, vector<32x32xf32>
    %cst_7 = arith.constant dense<0.000000e+00> : vector<16x32xf32>
    %9 = tpu.matmul %7, %8, %cst_7 {dimension_numbers = #tpu.dot_dimension_numbers<[1], [0], [0], [1], [0, 0, 1, 1], [], []>} : vector<16x32xf32>, vector<32x32xf32>, vector<16x32xf32> -> vector<16x32xf32>
    %c0_8 = arith.constant 0 : index
    %c32_9 = arith.constant 32 : index
    %10 = vector.load %arg4[%c0_8, %c32_9] : memref<8x128xf32, #tpu.memory_space<vmem>>, vector<1x32xf32>
    %11 = vector.broadcast %10 : vector<1x32xf32> to vector<16x32xf32>
    %12 = arith.addf %9, %11 : vector<16x32xf32>
    %cst_10 = arith.constant 0.000000e+00 : f32
    %13 = vector.broadcast %cst_10 : f32 to vector<16x32xf32>
    %14 = arith.maximumf %12, %13 : vector<16x32xf32>
    %c0_11 = arith.constant 0 : index
    %c64 = arith.constant 64 : index
    %15 = vector.load %arg2[%c0_11, %c64] : memref<32x192xf32, #tpu.memory_space<vmem>>, vector<32x64xf32>
    %cst_12 = arith.constant dense<0.000000e+00> : vector<16x64xf32>
    %16 = tpu.matmul %14, %15, %cst_12 {dimension_numbers = #tpu.dot_dimension_numbers<[1], [0], [0], [1], [0, 0, 1, 1], [], []>} : vector<16x32xf32>, vector<32x64xf32>, vector<16x64xf32> -> vector<16x64xf32>
    %c0_13 = arith.constant 0 : index
    %c64_14 = arith.constant 64 : index
    %17 = vector.load %arg4[%c0_13, %c64_14] : memref<8x128xf32, #tpu.memory_space<vmem>>, vector<1x64xf32>
    %18 = vector.broadcast %17 : vector<1x64xf32> to vector<16x64xf32>
    %19 = arith.addf %16, %18 : vector<16x64xf32>
    %20 = vector.extract_strided_slice %19 {offsets = [0, 8], sizes = [16, 56], strides = [1, 1]} : vector<16x64xf32> to vector<16x56xf32>
    %21 = vector.extract_strided_slice %19 {offsets = [0, 0], sizes = [16, 8], strides = [1, 1]} : vector<16x64xf32> to vector<16x8xf32>
    %22 = tpu.concatenate %20, %21 in 1 : vector<16x56xf32>, vector<16x8xf32> -> vector<16x64xf32>
    %23 = arith.maximumf %19, %22 : vector<16x64xf32>
    %24 = vector.extract_strided_slice %23 {offsets = [0, 16], sizes = [16, 48], strides = [1, 1]} : vector<16x64xf32> to vector<16x48xf32>
    %25 = vector.extract_strided_slice %23 {offsets = [0, 0], sizes = [16, 16], strides = [1, 1]} : vector<16x64xf32> to vector<16x16xf32>
    %26 = tpu.concatenate %24, %25 in 1 : vector<16x48xf32>, vector<16x16xf32> -> vector<16x64xf32>
    %27 = arith.maximumf %23, %26 : vector<16x64xf32>
    %28 = vector.extract_strided_slice %27 {offsets = [0, 32], sizes = [16, 32], strides = [1, 1]} : vector<16x64xf32> to vector<16x32xf32>
    %29 = vector.extract_strided_slice %27 {offsets = [0, 0], sizes = [16, 32], strides = [1, 1]} : vector<16x64xf32> to vector<16x32xf32>
    %30 = tpu.concatenate %28, %29 in 1 : vector<16x32xf32>, vector<16x32xf32> -> vector<16x64xf32>
    %31 = arith.maximumf %27, %30 : vector<16x64xf32>
    %32 = arith.subf %19, %31 : vector<16x64xf32>
    %33 = math.exp %32 : vector<16x64xf32>
    %c0_15 = arith.constant 0 : index
    %c0_16 = arith.constant 0 : index
    %34 = vector.load %arg3[%c0_15, %c0_16] : memref<64x192xf32, #tpu.memory_space<vmem>>, vector<64x64xf32>
    %cst_17 = arith.constant dense<0.000000e+00> : vector<16x64xf32>
    %35 = tpu.matmul %33, %34, %cst_17 {dimension_numbers = #tpu.dot_dimension_numbers<[1], [0], [0], [1], [0, 0, 1, 1], [], []>} : vector<16x64xf32>, vector<64x64xf32>, vector<16x64xf32> -> vector<16x64xf32>
    %36 = arith.divf %33, %35 : vector<16x64xf32>
    %c1 = arith.constant 1 : index
    %c0_18 = arith.constant 0 : index
    %37 = vector.load %arg4[%c1, %c0_18] : memref<8x128xf32, #tpu.memory_space<vmem>>, vector<1x64xf32>
    %38 = vector.broadcast %37 : vector<1x64xf32> to vector<16x64xf32>
    %39 = arith.subf %36, %38 : vector<16x64xf32>
    %c0_19 = arith.constant 0 : index
    %c128 = arith.constant 128 : index
    %40 = vector.load %arg2[%c0_19, %c128] : memref<32x192xf32, #tpu.memory_space<vmem>>, vector<32x64xf32>
    %cst_20 = arith.constant dense<0.000000e+00> : vector<16x64xf32>
    %41 = tpu.matmul %0, %40, %cst_20 {dimension_numbers = #tpu.dot_dimension_numbers<[1], [0], [0], [1], [0, 0, 1, 1], [], []>} : vector<16x32xf32>, vector<32x64xf32>, vector<16x64xf32> -> vector<16x64xf32>
    %42 = arith.mulf %39, %41 : vector<16x64xf32>
    %c0_21 = arith.constant 0 : index
    %c64_22 = arith.constant 64 : index
    %43 = vector.load %arg3[%c0_21, %c64_22] : memref<64x192xf32, #tpu.memory_space<vmem>>, vector<64x128xf32>
    %cst_23 = arith.constant dense<0.000000e+00> : vector<16x128xf32>
    %44 = tpu.matmul %42, %43, %cst_23 {dimension_numbers = #tpu.dot_dimension_numbers<[1], [0], [0], [1], [0, 0, 1, 1], [], []>} : vector<16x64xf32>, vector<64x128xf32>, vector<16x128xf32> -> vector<16x128xf32>
    %c0_24 = arith.constant 0 : index
    %c0_25 = arith.constant 0 : index
    %45 = vector.load %arg5[%c0_24, %c0_25] : memref<16x128xf32, #tpu.memory_space<vmem>>, vector<16x128xf32>
    tpu.vector_store %arg5[%c0_24, %c0_25], %44 {strides = array<i32>} : memref<16x128xf32, #tpu.memory_space<vmem>>, vector<16x128xf32>,
    return
  }
  func.func @transform_0(%arg0: i32) -> (i32, i32) {
    %c0_i32 = arith.constant 0 : i32
    %c0_i32_0 = arith.constant 0 : i32
    %c0_i32_1 = arith.constant 0 : i32
    return %c0_i32, %c0_i32_0 : i32, i32
  }
  func.func @transform_1(%arg0: i32) -> (i32, i32) {
    %c0_i32 = arith.constant 0 : i32
    %c0_i32_0 = arith.constant 0 : i32
    %c0_i32_1 = arith.constant 0 : i32
    return %c0_i32, %c0_i32_0 : i32, i32
  }
  func.func @transform_2(%arg0: i32) -> (i32, i32) {
    %c0_i32 = arith.constant 0 : i32
    %c0_i32_0 = arith.constant 0 : i32
    %c0_i32_1 = arith.constant 0 : i32
    return %c0_i32, %c0_i32_0 : i32, i32
  }
  func.func @transform_3(%arg0: i32) -> (i32, i32) {
    %c0_i32 = arith.constant 0 : i32
    %c0_i32_0 = arith.constant 0 : i32
    %c0_i32_1 = arith.constant 0 : i32
    return %c0_i32, %c0_i32_0 : i32, i32
  }
  func.func @transform_4(%arg0: i32) -> (i32, i32) {
    %c0_i32 = arith.constant 0 : i32
    %c0_i32_0 = arith.constant 0 : i32
    %c0_i32_1 = arith.constant 0 : i32
    return %c0_i32, %c0_i32_0 : i32, i32
  }
}

</mosaic_0001>

<bundles_post_ra>
// kernel: tpu_custom_call.1
= control target key start
LH: loop header
LB: loop body
LE: loop exit
PB: predicated region body
PF: predicated region fallthrough
CT: control target
= control target key end

     0   :  { %9 = vsyncpa [#allocation3], 0  ;;  %s1321_s0 = inlined_call_operand.hbm [shape: f32[16,32], index: 0, kind: input, shape index: {}]   ;;  %s1322_s1 = inlined_call_operand.hbm [shape: f32[32,192], index: 1, kind: input, shape index: {}]   ;;  %s1323_s2 = inlined_call_operand.hbm [shape: f32[64,192], index: 2, kind: input, shape index: {}]   ;;  %s1324_s3 = inlined_call_operand.vmem [shape: f32[8,128], index: 3, kind: input, shape index: {}]   ;;  %s1325_s4 = inlined_call_operand.hbm [shape: f32[16,128], index: 4, kind: output, shape index: {}]  }
   0x1   :  { %10 = vsyncpa [#allocation6], 0 }
   0x2   :  { %11 = vsyncpa [#allocation4], 0  ;;  %s1159_s15 = smov [#allocation5]   ;;  %s1065_s19 = scalar_lea.hbm %s1322_s1, 1024 }
   0x3   :  { %s29_s16 = sshll.u32 %s1159_s15, 4  ;;  %p1066_p0 = scmp.ne.s32.totalorder %s1322_s1, %s1065_s19  ;;  %s30_s16 = int_to_ptr.vmem [resolvable:$true] %s29_s16 }
   0x4   :  { %p1069_p1 = scmp.lt.u32.totalorder %s1065_s19, %s1322_s1 }
   0x6   :  { %p1071_p2 = pnand %p1069_p1, %p1066_p0 }
   0x8   :  { %1074 = shalt.err (!%p1071_p2)
}
   0x9   :  { %s1075_s24 = scalar_lea.vmem %s30_s16, 1024  ;;  %p1080_p4 = scmp.lt.s32.totalorder %s30_s16, %s30_s16 }
   0xa   :  { %p1076_p3 = scmp.ne.s32.totalorder %s30_s16, %s1075_s24  ;;  %p1081_p5 = scmp.lt.s32.totalorder %s1075_s24, %s1075_s24 }
   0xc   :  { %p1082_p6 = por %p1081_p5, %p1080_p4 }
   0xe   :  { %p1083_p7 = pnand %p1082_p6, %p1076_p3 }
  0x10   :  { %1086 = shalt.err (!%p1083_p7)
}
  0x11   :  { %s1160_s25 = smov 256   ;;  %s1161_s26 = smov 16  }
  0x12   :  { %35 = dma.hbm_to_vmem [thread:$0]  %s1322_s1, 1024, %s30_s16, [#allocation6], %s1160_s25, %s1160_s25, %s1161_s26  }
  0x13   :  { %s1162_s29 = smov [#allocation2]   ;;  %s1087_s7 = scalar_lea.hbm %s1321_s0, 256 }
  0x14   :  { %s17_s30 = sshll.u32 %s1162_s29, 4  ;;  %p1088_p8 = scmp.ne.s32.totalorder %s1321_s0, %s1087_s7  ;;  %s18_s30 = int_to_ptr.vmem [resolvable:$true] %s17_s30 }
  0x15   :  { %p1091_p9 = scmp.lt.u32.totalorder %s1087_s7, %s1321_s0 }
  0x17   :  { %p1093_p10 = pnand %p1091_p9, %p1088_p8 }
  0x19   :  { %1096 = shalt.err (!%p1093_p10)
}
  0x1a   :  { %s1097_s12 = scalar_lea.vmem %s18_s30, 256  ;;  %p1102_p12 = scmp.lt.s32.totalorder %s18_s30, %s18_s30 }
  0x1b   :  { %p1098_p11 = scmp.ne.s32.totalorder %s18_s30, %s1097_s12  ;;  %p1103_p13 = scmp.lt.s32.totalorder %s1097_s12, %s1097_s12 }
  0x1d   :  { %p1104_p0 = por %p1103_p13, %p1102_p12 }
  0x1f   :  { %p1105_p1 = pnand %p1104_p0, %p1098_p11 }
  0x21   :  { %1108 = shalt.err (!%p1105_p1)
}
  0x22   :  { %s1163_s1 = smov 128   ;;  %s1164_s13 = smov 8  }
  0x23   :  { %23 = dma.hbm_to_vmem [thread:$0]  %s1321_s0, 256, %s18_s30, [#allocation3], %s1163_s1, %s1163_s1, %s1164_s13  }
  0x24   :  { %s1165_s16 = smov [#allocation7]   ;;  %s1109_s20 = scalar_lea.hbm %s1323_s2, 2048 }
  0x25   :  { %s41_s17 = sshll.u32 %s1165_s16, 4  ;;  %p1110_p2 = scmp.ne.s32.totalorder %s1323_s2, %s1109_s20  ;;  %s42_s17 = int_to_ptr.vmem [resolvable:$true] %s41_s17 }
  0x26   :  { %p1113_p3 = scmp.lt.u32.totalorder %s1109_s20, %s1323_s2 }
  0x28   :  { %p1115_p4 = pnand %p1113_p3, %p1110_p2 }
  0x2a   :  { %1118 = shalt.err (!%p1115_p4)
}
  0x2b   :  { %s1119_s27 = scalar_lea.vmem %s42_s17, 2048  ;;  %p1124_p6 = scmp.lt.s32.totalorder %s42_s17, %s42_s17 }
  0x2c   :  { %p1120_p5 = scmp.ne.s32.totalorder %s42_s17, %s1119_s27  ;;  %p1125_p7 = scmp.lt.s32.totalorder %s1119_s27, %s1119_s27 }
  0x2e   :  { %p1126_p8 = por %p1125_p7, %p1124_p6 }
  0x30   :  { %p1127_p9 = pnand %p1126_p8, %p1120_p5 }
  0x32   :  { %1130 = shalt.err (!%p1127_p9)
}
  0x33   :  { %47 = dma.hbm_to_vmem [thread:$0]  %s1323_s2, 2048, %s42_s17, [#allocation6], %s1160_s25, %s1160_s25, %s1161_s26  }
  0x34   :  { %1153 = dma.done.wait [#allocation3], 256  }
  0x35   :  { %1154 = vsyncadd [#allocation3], 4294967040 }
  0x36   :  { %1155 = dma.done.wait [#allocation6], 3072  }
  0x37   :  { %1156 = vsyncadd [#allocation6], 4294964224  ;;  %vm70_vm0 = vcmask 261120   ;;  %v61_v0 = vld [vmem:[#allocation5] sm:$0xff]  ;;  %v62_v1 = vld [vmem:[#allocation5 + $0x10] sm:$0xff]  ;;  %s1166_s29 = smov 96  }
  0x38   :  { %v63_v2 = vld [vmem:[#allocation5 + $0x20] sm:$0xff]  ;;  %v918_v3 = vpack.c.bf16 %v62_v1, %v61_v0  ;;  %v64_v4 = vld [vmem:[#allocation5 + $0x30] sm:$0xff]  ;;  %v997_v6 = vpack.i.bf16 %v62_v1, %v61_v0  ;;  %v1247_v9 = vld [vmem:[#allocation2 + $0x8] sm:$0xff]  ;;  %s1167_s26 = smov 64   ;;  %s1168_s30 = smov 56   ;;  %vm367_vm1 = vcmask 457728  }
  0x39   :  { %v59_v5 = vld [vmem:[#allocation2] sm:$0xff]  ;;  %v922_v7 = vpack.c.bf16 %v64_v4, %v63_v2  ;;  %v1002_v8 = vpack.i.bf16 %v64_v4, %v63_v2  ;;  %s1169_s5 = smov 120   ;;  %s1170_s6 = smov 48   ;;  %v415_v53 = vld [vmem:[#allocation7] sm:$0xff]  ;;  %vm386_vm2 = vcmask 392192   ;;  %vm423_vm3 = vcmask 523264  }
  0x3a   :  { %844 = vmatprep.mubr.msk.f32.mxu1 %vm70_vm0, %v59_v5  ;;  %919 = vmatprep.subr.bf16.mxu1 %v918_v3  ;;  %v778_v10 = vld [vmem:[%s1324_s3] ss:$0 sm:$0xff]  ;;  %s1171_s7 = smov 112   ;;  %v417_v56 = vld [vmem:[#allocation7 + $0x20] sm:$0xff]  ;;  %s1172_s8 = smov 32  }
  0x3b   :  { %998 = vrot.lane.b32.xlu0 %v997_v6, %s1166_s29  ;;  %921 = vmatpush3.bf16.msra.mxu1 %v918_v3  ;;  %v416_v54 = vld [vmem:[#allocation7 + $0x10] sm:$0xff]  ;;  %v419_v63 = vld [vmem:[#allocation7 + $0x40] sm:$0xff]  ;;  %s1173_s11 = smov [#allocation8]  }
  0x3c   :  { %923 = vmatprep.subr.bf16.mxu1 %v922_v7  ;;  %1008 = vrot.lane.b32.xlu1 %v997_v6, %s1167_s26  ;;  %v942_v55 = vpack.c.bf16 %v416_v54, %v415_v53  ;;  %v418_v57 = vld [vmem:[#allocation7 + $0x30] sm:$0xff]  ;;  %v421_v1 = vld [vmem:[#allocation7 + $0x60] sm:$0xff]  ;;  %s765_s12 = sshll.u32 %s1173_s11, 4  ;;  %s766_s12 = int_to_ptr.vmem [resolvable:$true] %s765_s12 }
  0x3d   :  { %v946_v58 = vpack.c.bf16 %v418_v57, %v417_v56  ;;  %v420_v0 = vld [vmem:[#allocation7 + $0x50] sm:$0xff]  ;;  %s1131_s14 = scalar_lea.vmem %s766_s12, 256  ;;  %p1136_p11 = scmp.lt.s32.totalorder %s766_s12, %s766_s12 }
  0x3e   :  { %v950_v2 = vpack.c.bf16 %v420_v0, %v419_v63  ;;  %v422_v3 = vld [vmem:[#allocation7 + $0x70] sm:$0xff]  ;;  %p1132_p10 = scmp.ne.s32.totalorder %s766_s12, %s1131_s14  ;;  %p1137_p12 = scmp.lt.s32.totalorder %s1131_s14, %s1131_s14 }
  0x3f   :  { %1003 = vrot.lane.b32.xlu0 %v1002_v8, %s1166_s29  ;;  %925 = vmatpush3.bf16.msra.mxu1 %v922_v7  ;;  %v954_v6 = vpack.c.bf16 %v422_v3, %v421_v1 }
  0x40   :  { %1013 = vrot.lane.b32.xlu1 %v1002_v8, %s1167_s26  ;;  %p1138_p13 = por %p1137_p12, %p1136_p11 }
  0x42   :  { %845 = vmatmul.mubr.msk.f32.vlgmr.msra.gmra.mrb[0].mxu1 %vm70_vm0, %v1247_v9  ;;  %p1139_p0 = pnand %p1138_p13, %p1132_p10 }
  0x43   :  { %171 = vrot.lane.b32.xlu0 %v778_v10, %s1166_s29 }
  0x44   :  { %269 = vrot.lane.b32.xlu1 %v778_v10, %s1167_s26 }
  0xad   :  { %v999_v11 = vpop.permute.xlu0 %998 }
  0xae   :  { %v1001_v12 = vunpack.i.h.bf16 %v999_v11  ;;  %v1000_v13 = vunpack.i.l.bf16 %v999_v11  ;;  %v1009_v19 = vpop.permute.xlu1 %1008  ;;  %v517_v11 = vld [vmem:[#allocation5 + $0x18] sm:$0xff] }
  0xaf   :  { %v1011_v20 = vunpack.i.h.bf16 %v1009_v19  ;;  %v1010_v21 = vunpack.i.l.bf16 %v1009_v19 }
  0xb0   :  { %v926_v14 = vpack.c.bf16 %v1001_v12, %v1000_v13  ;;  %v518_v12 = vld [vmem:[#allocation5 + $0x28] sm:$0xff] }
  0xb1   :  { %v1004_v15 = vpop.permute.xlu0 %1003  ;;  %v934_v22 = vpack.c.bf16 %v1011_v20, %v1010_v21  ;;  %v604_v20 = vld [vmem:[#allocation7 + $0x38] sm:$0xff]  ;;  %v602_v21 = vld [vmem:[#allocation7 + $0x28] sm:$0xff] }
  0xb2   :  { %v1006_v16 = vunpack.i.h.bf16 %v1004_v15  ;;  %v1005_v17 = vunpack.i.l.bf16 %v1004_v15  ;;  %927 = vmatprep.subr.bf16.mxu1 %v926_v14  ;;  %v1014_v23 = vpop.permute.xlu1 %1013  ;;  %v600_v15 = vld [vmem:[#allocation7 + $0x18] sm:$0xff] }
  0xb3   :  { %929 = vmatpush3.bf16.msra.mxu1 %v926_v14  ;;  %v1016_v25 = vunpack.i.h.bf16 %v1014_v23  ;;  %v1015_v26 = vunpack.i.l.bf16 %v1014_v23  ;;  %935 = vmatprep.subr.bf16.mxu0 %v934_v22  ;;  %v519_v14 = vld [vmem:[#allocation5 + $0x38] sm:$0xff]  ;;  %v1027_v23 = vpack.i.bf16 %v602_v21, %v417_v56 }
  0xb4   :  { %v930_v18 = vpack.c.bf16 %v1006_v16, %v1005_v17  ;;  %937 = vmatpush3.bf16.msra.mxu0 %v934_v22  ;;  %v598_v16 = vld [vmem:[#allocation7 + $0x8] sm:$0xff]  ;;  %v962_v17 = vpack.c.bf16 %v519_v14, %v518_v12  ;;  %v1032_v22 = vpack.i.bf16 %v604_v20, %v418_v57 }
  0xb5   :  { %v938_v30 = vpack.c.bf16 %v1016_v25, %v1015_v26  ;;  %v172_v33 = vpop.permute.xlu0 %171  ;;  %v1017_v19 = vpack.i.bf16 %v598_v16, %v415_v53  ;;  %v606_v25 = vld [vmem:[#allocation7 + $0x48] sm:$0xff] }
  0xb6   :  { %931 = vmatprep.subr.bf16.mxu1 %v930_v18  ;;  %v270_v40 = vpop.permute.xlu1 %269 }
  0xb7   :  { %933 = vmatpush3.bf16.msra.mxu1 %v930_v18  ;;  %939 = vmatprep.subr.bf16.mxu0 %v938_v30  ;;  %v1022_v18 = vpack.i.bf16 %v600_v15, %v416_v54 }
  0xb8   :  { %941 = vmatpush3.bf16.msra.mxu0 %v938_v30  ;;  %943 = vmatprep.subr.bf16.mxu1 %v942_v55 }
 0x115   :  { %v846_v24 = vpop.f32.mrb[0].mxu1 }
 0x116   :  { %v149_v27 = vadd.f32 %v846_v24, %v778_v10  ;;  %v143_v28 = vpop.f32.mrb[1].mxu1  ;;  %v608_v24 = vld [vmem:[#allocation7 + $0x58] sm:$0xff] }
 0x117   :  { %v144_v29 = vadd.f32 %v778_v10, %v143_v28  ;;  %v516_v10 = vld [vmem:[#allocation5 + $0x8] sm:$0xff]  ;;  %v1042_v26 = vpack.i.bf16 %v608_v24, %v420_v0  ;;  %v612_v28 = vld [vmem:[#allocation7 + $0x78] sm:$0xff] }
 0x118   :  { %v153_v32 = vmax.f32 %v149_v27, 0.0  ;;  %v958_v13 = vpack.c.bf16 %v517_v11, %v516_v10  ;;  %v1037_v27 = vpack.i.bf16 %v606_v25, %v419_v63  ;;  %v1052_v30 = vpack.i.bf16 %v612_v28, %v422_v3 }
 0x119   :  { %v152_v31 = vmax.f32 %v144_v29, 0.0  ;;  %v610_v29 = vld [vmem:[#allocation7 + $0x68] sm:$0xff] }
 0x11a   :  { %959 = vmatprep.subr.bf16.mxu0 %v958_v13 }
 0x11b   :  { %855 = vmatprep.mubr.msk.f32.mxu1 %vm70_vm0, %v152_v31  ;;  %v1047_v31 = vpack.i.bf16 %v610_v29, %v421_v1 }
 0x11c   :  { %856 = vmatmul.mubr.msk.f32.vlgmr.msra.gmra.mrb[2].mxu1 %vm70_vm0, %v153_v32 }
 0x11d   :  { %945 = vmatpush3.bf16.msra.mxu1 %v942_v55 }
 0x11e   :  { %947 = vmatprep.subr.bf16.mxu1 %v946_v58 }
 0x121   :  { %949 = vmatpush3.bf16.msra.mxu1 %v946_v58 }
 0x122   :  { %951 = vmatprep.subr.bf16.mxu1 %v950_v2 }
 0x125   :  { %953 = vmatpush3.bf16.msra.mxu1 %v950_v2 }
 0x126   :  { %955 = vmatprep.subr.bf16.mxu1 %v954_v6 }
 0x129   :  { %957 = vmatpush3.bf16.msra.mxu1 %v954_v6 }
 0x1ef   :  { %v857_v34 = vpop.f32.mrb[2].mxu1 }
 0x1f0   :  { %v252_v35 = vadd.f32 %v857_v34, %v172_v33  ;;  %v246_v36 = vpop.f32.mrb[3].mxu1 }
 0x1f1   :  { %v247_v37 = vadd.f32 %v246_v36, %v172_v33 }
 0x1f2   :  { %v256_v39 = vmax.f32 %v252_v35, 0.0 }
 0x1f3   :  { %v255_v38 = vmax.f32 %v247_v37, 0.0 }
 0x1f5   :  { %866 = vmatprep.mubr.msk.f32.mxu0 %vm70_vm0, %v255_v38 }
 0x1f6   :  { %867 = vmatmul.mubr.msk.f32.vlgmr.msra.gmra.mrb[0].mxu0 %vm70_vm0, %v256_v39 }
 0x1f7   :  { %896 = vmatprep.mubr.msk.f32.mxu0 %vm70_vm0, %v59_v5  ;;  %961 = vmatpush3.bf16.msra.mxu0 %v958_v13 }
 0x1f8   :  { %963 = vmatprep.subr.bf16.mxu0 %v962_v17 }
 0x1fb   :  { %965 = vmatpush3.bf16.msra.mxu0 %v962_v17 }
 0x1fe   :  { %897 = vmatmul.mubr.msk.f32.vlgmr.msra.gmra.mrb[2].mxu0 %vm70_vm0, %v1247_v9 }
 0x2c9   :  { %v868_v41 = vpop.f32.mrb[0].mxu0 }
 0x2ca   :  { %v344_v42 = vpop.f32.mrb[1].mxu0  ;;  %v1267_v44 = vadd.f32 %v868_v41, %v270_v40 }
 0x2cb   :  { %v1263_v43 = vadd.f32 %v344_v42, %v270_v40 }
 0x2cd   :  { %361 = vrot.lane.b32.xlu1 %v1263_v43, %s1168_s30  ;;  %355 = vrot.lane.b32.xlu0 %v1263_v43, %s1169_s5 }
 0x2d1   :  { %363 = vrot.lane.b32.xlu1 %v1267_v44, %s1168_s30  ;;  %357 = vrot.lane.b32.xlu0 %v1267_v44, %s1169_s5 }
 0x33f   :  { %v362_v45 = vpop.permute.xlu1 %361  ;;  %v356_v46 = vpop.permute.xlu0 %355 }
 0x340   :  { %v368_v47 = vsel %vm367_vm1, %v356_v46, %v362_v45 }
 0x341   :  { %v370_v48 = vmax.f32 %v1263_v43, %v368_v47 }
 0x343   :  { %v364_v49 = vpop.permute.xlu1 %363  ;;  %380 = vrot.lane.b32.xlu1 %v370_v48, %s1170_s6  ;;  %374 = vrot.lane.b32.xlu0 %v370_v48, %s1171_s7  ;;  %v358_v50 = vpop.permute.xlu0 %357 }
 0x344   :  { %v369_v51 = vsel %vm367_vm1, %v358_v50, %v364_v49 }
 0x345   :  { %v371_v52 = vmax.f32 %v1267_v44, %v369_v51 }
 0x347   :  { %382 = vrot.lane.b32.xlu1 %v371_v52, %s1170_s6  ;;  %376 = vrot.lane.b32.xlu0 %v371_v52, %s1171_s7 }
 0x3b5   :  { %v381_v59 = vpop.permute.xlu1 %380  ;;  %v375_v60 = vpop.permute.xlu0 %374 }
 0x3b6   :  { %v387_v61 = vsel %vm386_vm2, %v375_v60, %v381_v59 }
 0x3b7   :  { %v389_v62 = vmax.f32 %v370_v48, %v387_v61 }
 0x3b9   :  { %v383_v4 = vpop.permute.xlu1 %382  ;;  %399 = vrot.lane.b32.xlu1 %v389_v62, %s1172_s8  ;;  %393 = vrot.lane.b32.xlu0 %v389_v62, %s1166_s29  ;;  %v377_v5 = vpop.permute.xlu0 %376 }
 0x3ba   :  { %v388_v7 = vsel %vm386_vm2, %v377_v5, %v383_v4 }
 0x3bb   :  { %v390_v8 = vmax.f32 %v371_v52, %v388_v7 }
 0x3bd   :  { %401 = vrot.lane.b32.xlu1 %v390_v8, %s1172_s8  ;;  %395 = vrot.lane.b32.xlu0 %v390_v8, %s1166_s29 }
 0x3c1   :  { %1023 = vrot.lane.b32.xlu1 %v1022_v18, %s1167_s26  ;;  %1018 = vrot.lane.b32.xlu0 %v1017_v19, %s1167_s26  ;;  %v898_v18 = vpop.f32.mrb[2].mxu0 }
 0x3c2   :  { %v586_v19 = vpop.f32.mrb[3].mxu0 }
 0x3c5   :  { %1033 = vrot.lane.b32.xlu1 %v1032_v22, %s1167_s26  ;;  %1028 = vrot.lane.b32.xlu0 %v1027_v23, %s1167_s26  ;;  %v787_v23 = vld [vmem:[%s1324_s3 + $0x1] ss:$0 sm:$0xff] }
 0x3c9   :  { %1043 = vrot.lane.b32.xlu1 %v1042_v26, %s1167_s26  ;;  %1038 = vrot.lane.b32.xlu0 %v1037_v27, %s1167_s26 }
 0x3cd   :  { %1053 = vrot.lane.b32.xlu1 %v1052_v30, %s1167_s26  ;;  %1048 = vrot.lane.b32.xlu0 %v1047_v31, %s1167_s26 }
 0x42b   :  { %v400_v32 = vpop.permute.xlu1 %399  ;;  %v394_v33 = vpop.permute.xlu0 %393 }
 0x42c   :  { %v405_v34 = vsel %vm70_vm0, %v394_v33, %v400_v32 }
 0x42d   :  { %v407_v35 = vmax.f32 %v389_v62, %v405_v34 }
 0x42f   :  { %v409_v36 = vsub.f32 %v1263_v43, %v407_v35  ;;  %v402_v37 = vpop.permute.xlu1 %401  ;;  %v396_v38 = vpop.permute.xlu0 %395 }
 0x430   :  { %v406_v9 = vsel %vm70_vm0, %v396_v38, %v402_v37 }
 0x431   :  { %v411_v39 = vmul.f32 1.442695, %v409_v36  ;;  %v408_v40 = vmax.f32 %v390_v8, %v406_v9 }
 0x433   :  { %1057 = vpow2.f32 %v411_v39  ;;  %v410_v41 = vsub.f32 %v1267_v44, %v408_v40  ;;  %v1024_v47 = vpop.permute.xlu1 %1023  ;;  %v1019_v43 = vpop.permute.xlu0 %1018 }
 0x434   :  { %v1026_v48 = vunpack.i.h.bf16 %v1024_v47  ;;  %v1025_v49 = vunpack.i.l.bf16 %v1024_v47  ;;  %v1021_v50 = vunpack.i.h.bf16 %v1019_v43  ;;  %v1020_v51 = vunpack.i.l.bf16 %v1019_v43 }
 0x435   :  { %v413_v42 = vmul.f32 1.442695, %v410_v41 }
 0x436   :  { %v661_v52 = vsel %vm423_vm3, %v1020_v51, %v1021_v50  ;;  %v662_v53 = vsel %vm423_vm3, %v1025_v49, %v1026_v48 }
 0x437   :  { %1059 = vpow2.f32 %v413_v42  ;;  %v1034_v44 = vpop.permute.xlu1 %1033  ;;  %v1029_v54 = vpop.permute.xlu0 %1028  ;;  %v966_v55 = vpack.c.bf16 %v662_v53, %v661_v52 }
 0x438   :  { %v1036_v56 = vunpack.i.h.bf16 %v1034_v44  ;;  %v1035_v57 = vunpack.i.l.bf16 %v1034_v44  ;;  %v1031_v58 = vunpack.i.h.bf16 %v1029_v54  ;;  %v1030_v59 = vunpack.i.l.bf16 %v1029_v54 }
 0x439   :  { %967 = vmatprep.subr.bf16.mxu0 %v966_v55 }
 0x43a   :  { %969 = vmatpush3.bf16.msra.mxu0 %v966_v55  ;;  %v663_v60 = vsel %vm423_vm3, %v1030_v59, %v1031_v58  ;;  %v664_v61 = vsel %vm423_vm3, %v1035_v57, %v1036_v56 }
 0x43b   :  { %v1044_v62 = vpop.permute.xlu1 %1043  ;;  %v1039_v63 = vpop.permute.xlu0 %1038  ;;  %v970_v0 = vpack.c.bf16 %v664_v61, %v663_v60 }
 0x43c   :  { %v1046_v1 = vunpack.i.h.bf16 %v1044_v62  ;;  %v1045_v2 = vunpack.i.l.bf16 %v1044_v62  ;;  %v1041_v3 = vunpack.i.h.bf16 %v1039_v63  ;;  %v1040_v4 = vunpack.i.l.bf16 %v1039_v63 }
 0x43d   :  { %v1058_v45 = vpop.eup %1057  ;;  %971 = vmatprep.subr.bf16.mxu0 %v970_v0 }
 0x43e   :  { %885 = vmatprep.mubr.msk.f32.mxu1 %vm423_vm3, %v1058_v45  ;;  %973 = vmatpush3.bf16.msra.mxu0 %v970_v0  ;;  %v665_v5 = vsel %vm423_vm3, %v1040_v4, %v1041_v3  ;;  %v666_v6 = vsel %vm423_vm3, %v1045_v2, %v1046_v1 }
 0x43f   :  { %v1054_v7 = vpop.permute.xlu1 %1053  ;;  %v1049_v8 = vpop.permute.xlu0 %1048  ;;  %v974_v10 = vpack.c.bf16 %v666_v6, %v665_v5 }
 0x440   :  { %v1056_v11 = vunpack.i.h.bf16 %v1054_v7  ;;  %v1055_v12 = vunpack.i.l.bf16 %v1054_v7  ;;  %v1051_v13 = vunpack.i.h.bf16 %v1049_v8  ;;  %v1050_v14 = vunpack.i.l.bf16 %v1049_v8 }
 0x441   :  { %v1060_v46 = vpop.eup %1059  ;;  %975 = vmatprep.subr.bf16.mxu0 %v974_v10 }
 0x442   :  { %886 = vmatmul.mubr.msk.f32.vlgmr.msra.gmra.mrb[4].mxu1 %vm423_vm3, %v1060_v46  ;;  %977 = vmatpush3.bf16.msra.mxu0 %v974_v10  ;;  %v667_v15 = vsel %vm423_vm3, %v1050_v14, %v1051_v13  ;;  %v668_v16 = vsel %vm423_vm3, %v1055_v12, %v1056_v11 }
 0x443   :  { %v978_v17 = vpack.c.bf16 %v668_v16, %v667_v15 }
 0x445   :  { %979 = vmatprep.subr.bf16.mxu0 %v978_v17 }
 0x446   :  { %981 = vmatpush3.bf16.msra.mxu0 %v978_v17 }
 0x515   :  { %v887_v20 = vpop.f32.mrb[4].mxu1 }
 0x516   :  { %1061 = vrcp.f32 %v887_v20  ;;  %v496_v21 = vpop.f32.mrb[5].mxu1 }
 0x517   :  { %1063 = vrcp.f32 %v496_v21 }
 0x520   :  { %v1062_v22 = vpop.eup %1061 }
 0x521   :  { %v1064_v24 = vpop.eup %1063  ;;  %v508_v25 = vmul.f32 %v1062_v22, %v1060_v46 }
 0x522   :  { %v506_v26 = vmul.f32 %v1064_v24, %v1058_v45 }
 0x523   :  { %v515_v27 = vsub.f32 %v508_v25, %v787_v23 }
 0x524   :  { %v514_v28 = vsub.f32 %v506_v26, %v787_v23 }
 0x525   :  { %v596_v29 = vmul.f32 %v898_v18, %v515_v27 }
 0x526   :  { %v595_v30 = vmul.f32 %v586_v19, %v514_v28 }
 0x528   :  { %915 = vmatprep.mubr.msk.f32.mxu0 %vm423_vm3, %v595_v30 }
 0x529   :  { %916 = vmatmul.mubr.msk.f32.vlgmr.msra.gmra.mrb[4].mxu0 %vm423_vm3, %v596_v29 }
 0x5fc   :  { %v917_v31 = vpop.f32.mrb[4].mxu0 }
 0x5fd   :  { %759 = vst [vmem:[#allocation8 + $0x8] sm:$0xff] %v917_v31  ;;  %v749_v32 = vpop.f32.mrb[5].mxu0 }
 0x5fe   :  { %758 = vst [vmem:[#allocation8] sm:$0xff] %v749_v32 }
 0x5ff   :  { %1142 = shalt.err (!%p1139_p0)
}
 0x600   :  { %s1143_s16 = scalar_lea.hbm %s1325_s4, 256 }
 0x601   :  { %p1144_p1 = scmp.ne.s32.totalorder %s1325_s4, %s1143_s16  ;;  %p1147_p2 = scmp.lt.u32.totalorder %s1143_s16, %s1325_s4 }
 0x603   :  { %p1149_p3 = pnand %p1147_p2, %p1144_p1 }
 0x605   :  { %1152 = shalt.err (!%p1149_p3)
}
 0x606   :  { %771 = dma.vmem_to_hbm [thread:$0]  %s766_s12, 256, %s1325_s4, [#allocation4], %s1163_s1, %s1163_s1, %s1164_s13  }
 0x607   :  { %1157 = dma.done.wait [#allocation4], 256  }
 0x608   :  { %1158 = vsyncadd [#allocation4], 4294967040 }
 0x609   :  { %775 = vsyncpa [#allocation3], 1 }
 0x60a   :  { %776 = vsyncpa [#allocation6], 1 }
 0x60b   :  { %777 = vsyncpa [#allocation4], 1 }

</bundles_post_ra>
